<compile_context>
chip_gen: v6e
topology: v6e:2x2x1
jax: 0.10.0
libtpu: 0.0.40
codegen_flags: <defaults>
</compile_context>

<pallas_src>
import math

import jax
import jax.numpy as jnp
from jax.experimental import pallas as pl
from jax.experimental.pallas import tpu as pltpu

EMBED_DIM = 128
N_HEAD = 4
HEAD_DIM = EMBED_DIM // N_HEAD


# ---------------------------------------------------------------------------
# Kernel: full multi-head self-attention for a (block_b, T, E) batch tile.
# ---------------------------------------------------------------------------
def mha_kernel(x_ref, wqkv_ref, bqkv_ref, wo_ref, bo_ref, o_ref,
               kbd_ref, vbd_ref, p_ref):
    bb, t, e = x_ref.shape
    hd = HEAD_DIM

    # Fold batch into rows: lane-dense (bb*t, E) slab for the projections.
    x = x_ref[...].reshape(bb * t, e).astype(jnp.bfloat16)

    # Fused QKV projection: single (bb*t, E) @ (E, 3E) MXU pass, f32 accumulate.
    # (1/sqrt(head_dim) is already folded into the Q columns of w_qkv/b_qkv.)
    qkv = jnp.dot(x, wqkv_ref[...], preferred_element_type=jnp.float32)
    qkv = (qkv + bqkv_ref[...]).astype(jnp.bfloat16)           # (bb*t, 3E)

    q = qkv[:, :e].reshape(bb, t, e)                           # (bb, T, E)
    k = qkv[:, e:2 * e].reshape(bb, t, e)
    v = qkv[:, 2 * e:].reshape(bb, t, e)

    # Build block-diagonal K / V in VMEM scratch: sublane group h holds head
    # h's keys/values in its own 32-lane column band, zeros elsewhere.
    # -> scores for ALL heads come from one 128-deep matmul per batch row and
    #    P @ V_bd lands directly in concatenated-head (lane-dense 128) layout.
    kbd_ref[...] = jnp.zeros_like(kbd_ref)
    vbd_ref[...] = jnp.zeros_like(vbd_ref)
    for h in range(N_HEAD):                                    # static unroll
        rs = slice(h * t, (h + 1) * t)                         # packed rows
        cs = slice(h * hd, (h + 1) * hd)                       # head's lanes
        kbd_ref[:, rs, cs] = k[:, :, cs]
        vbd_ref[:, rs, cs] = v[:, :, cs]

    # Packed scores: (bb, T, H*T); column group h*T:(h+1)*T is head h.
    s = jnp.einsum('bqd,bjd->bqj', q, kbd_ref[...],
                   preferred_element_type=jnp.float32)

    # Segmented (per-head) softmax in f32; normalized bf16 probabilities are
    # written into a packed VMEM scratch slab (no list + concatenate).
    for h in range(N_HEAD):                                    # static unroll
        sh = s[:, :, h * t:(h + 1) * t]
        m = jnp.max(sh, axis=-1, keepdims=True)
        p = jnp.exp(sh - m)
        p = p * pl.reciprocal(jnp.sum(p, axis=-1, keepdims=True), approx=True)
        p_ref[:, :, h * t:(h + 1) * t] = p.astype(jnp.bfloat16)

    # P @ V_blockdiag: one (T, H*T) @ (H*T, E) matmul per batch row; result is
    # already the concatenated-head (bb, T, E) tile -> no concat needed.
    o = jnp.einsum('bqj,bjd->bqd', p_ref[...], vbd_ref[...],
                   preferred_element_type=jnp.float32)

    # Output projection: single (bb*t, E) @ (E, E) MXU pass, K = 128.
    out = jnp.dot(o.reshape(bb * t, e).astype(jnp.bfloat16), wo_ref[...],
                  preferred_element_type=jnp.float32) + bo_ref[...]
    o_ref[...] = out.reshape(bb, t, e)


# ---------------------------------------------------------------------------
# Wrapper
# ---------------------------------------------------------------------------
def _default_block_b(B, T):
    """Generation-aware batch-tile choice."""
    try:
        kind = jax.devices()[0].device_kind.lower()
    except Exception:  # pragma: no cover - defensive
        kind = ""
    # v7x (and v5p/v4/v3 megacore) have 2 TensorCores: give the grid >= 2
    # steps so both cores run; v5e/v6e have 1 TC, keep a single grid step.
    two_core = any(tag in kind for tag in ("v7", "v5p", "v4", "v3"))
    bb = B
    if two_core and bb % 2 == 0 and bb > 1:
        bb //= 2
    # Scale-safety: keep block_b*T (projection rows) VMEM-friendly.
    while bb * T > 2048 and bb % 2 == 0:
        bb //= 2
    return bb


def altan_multihead(x, w_qkv, b_qkv, w_o, b_o, *, block_b=None,
                    vmem_limit_bytes=None):
    """Multi-head self-attention (AltanMultiHead.forward).

    x:      (B, T, E) float32
    w_qkv:  (E, 3E)   bf16  (= torch in_proj_weight.T, Q cols pre-scaled)
    b_qkv:  (1, 3E)   f32   (= torch in_proj_bias, Q third pre-scaled)
    w_o:    (E, E)    bf16  (= torch out_proj.weight.T)
    b_o:    (1, E)    f32   (= torch out_proj.bias)
    """
    B, T, E = x.shape
    assert E == EMBED_DIM, "kernel is specialized for embed_dim=128"
    # T must be a multiple of 8 (f32 sublane tile) so the in-kernel reshapes
    # stay layout metadata instead of relayout copies.
    assert T % 8 == 0, "pad T to a multiple of 8 before calling the kernel"

    if block_b is None:
        block_b = _default_block_b(B, T)
    assert B % block_b == 0
    grid = (B // block_b,)

    if vmem_limit_bytes is None:
        blk = block_b * T
        est = (
            2 * 2 * blk * E * 4                   # x / out blocks (double-buffered)
            + 2 * (E * 3 * E + E * E) * 2         # bf16 weights (double-buffered)
            + (3 * E + E) * 4                     # biases
            + blk * 3 * E * (4 + 2)               # qkv slab f32 + bf16
            + 2 * block_b * N_HEAD * T * E * 2    # block-diag K/V scratch
            + blk * N_HEAD * T * (4 + 2)          # scores f32 + probs bf16
            + 2 * blk * E * 4                     # attn out + proj out f32
        )
        vmem_limit_bytes = int(min(64 << 20, max(32 << 20, 2 * est)))

    def const2d(a):
        return pl.BlockSpec(a.shape, lambda i: (0, 0))

    return pl.pallas_call(
        mha_kernel,
        out_shape=jax.ShapeDtypeStruct((B, T, E), jnp.float32),
        grid_spec=pltpu.PrefetchScalarGridSpec(
            num_scalar_prefetch=0,
            grid=grid,
            in_specs=[
                pl.BlockSpec((block_b, T, E), lambda i: (i, 0, 0)),
                const2d(w_qkv), const2d(b_qkv), const2d(w_o), const2d(b_o),
            ],
            out_specs=pl.BlockSpec((block_b, T, E), lambda i: (i, 0, 0)),
            scratch_shapes=[
                pltpu.VMEM((block_b, N_HEAD * T, E), jnp.bfloat16),   # K blockdiag
                pltpu.VMEM((block_b, N_HEAD * T, E), jnp.bfloat16),   # V blockdiag
                pltpu.VMEM((block_b, T, N_HEAD * T), jnp.bfloat16),   # packed probs
            ],
        ),
        compiler_params=pltpu.CompilerParams(
            dimension_semantics=("parallel",),
            vmem_limit_bytes=vmem_limit_bytes,
        ),
    )(x, w_qkv, b_qkv, w_o, b_o)


# ---------------------------------------------------------------------------
# Pure-JAX reference (f32), matching nn.MultiheadAttention semantics.
# ---------------------------------------------------------------------------
def reference_mha(x, in_proj_w, in_proj_b, out_proj_w, out_proj_b, n_head):
    B, T, E = x.shape
    hd = E // n_head
    qkv = x @ in_proj_w.T + in_proj_b                  # (B, T, 3E)
    q, k, v = jnp.split(qkv, 3, axis=-1)

    def heads(a):
        return a.reshape(B, T, n_head, hd).transpose(0, 2, 1, 3)  # (B, H, T, hd)

    q, k, v = heads(q), heads(k), heads(v)
    s = jnp.einsum('bhqd,bhkd->bhqk', q, k) / math.sqrt(hd)
    p = jax.nn.softmax(s, axis=-1)
    o = jnp.einsum('bhqk,bhkd->bhqd', p, v)
    o = o.transpose(0, 2, 1, 3).reshape(B, T, E)
    return o @ out_proj_w.T + out_proj_b


# ---------------------------------------------------------------------------
if __name__ == "__main__":
    key = jax.random.PRNGKey(0)
    kx, kw, kb1, ko, kb2 = jax.random.split(key, 5)

    B, T, E = 2, 8, EMBED_DIM
    x = jax.random.normal(kx, (B, T, E), jnp.float32)

    w_scale = 1.0 / math.sqrt(E)
    # PyTorch-layout parameters.
    in_proj_w = w_scale * jax.random.normal(kw, (3 * E, E), jnp.float32)   # (3E, E)
    in_proj_b = 0.02 * jax.random.normal(kb1, (3 * E,), jnp.float32)
    out_proj_w = w_scale * jax.random.normal(ko, (E, E), jnp.float32)      # (E, E)
    out_proj_b = 0.02 * jax.random.normal(kb2, (E,), jnp.float32)

    # Pack for the kernel: pre-transposed (in, out) weights, bf16 for the MXU,
    # with the 1/sqrt(head_dim) q-scale folded into the Q columns / Q bias.
    q_scale = 1.0 / math.sqrt(HEAD_DIM)
    col_scale = jnp.concatenate([jnp.full((E,), q_scale, jnp.float32),
                                 jnp.ones((2 * E,), jnp.float32)])
    w_qkv = (in_proj_w.T * col_scale[None, :]).astype(jnp.bfloat16)  # (E, 3E)
    b_qkv = (in_proj_b * col_scale).reshape(1, 3 * E)                # f32
    w_o = out_proj_w.T.astype(jnp.bfloat16)                          # (E, E)
    b_o = out_proj_b.reshape(1, E)                                   # f32

    out = altan_multihead(x, w_qkv, b_qkv, w_o, b_o)
    jax.block_until_ready(out)

    assert out.shape == (B, T, E) and out.dtype == jnp.float32
    ref = reference_mha(x, in_proj_w, in_proj_b, out_proj_w, out_proj_b, N_HEAD)
    assert jnp.allclose(out, ref, rtol=5e-2, atol=5e-2), (
        f"max abs err = {jnp.max(jnp.abs(out - ref))}")
    print("KERNEL_OK")
</pallas_src>

<mosaic_0001>
module attributes {stable_mosaic.version = 11 : i64} {
  func.func @mha_kernel(%arg0: i32, %arg1: memref<2x8x128xf32, #tpu.memory_space<vmem>>, %arg2: memref<128x384xbf16, #tpu.memory_space<vmem>>, %arg3: memref<1x384xf32, #tpu.memory_space<vmem>>, %arg4: memref<128x128xbf16, #tpu.memory_space<vmem>>, %arg5: memref<1x128xf32, #tpu.memory_space<vmem>>, %arg6: memref<2x8x128xf32, #tpu.memory_space<vmem>>, %arg7: memref<2x32x128xbf16, #tpu.memory_space<vmem>>, %arg8: memref<2x32x128xbf16, #tpu.memory_space<vmem>>, %arg9: memref<2x8x32xbf16, #tpu.memory_space<vmem>>) attributes {dimension_semantics = [#tpu.dimension_semantics<parallel>], iteration_bounds = array<i64: 1>, scalar_prefetch = 0 : i64, scratch_operands = 3 : i64, tpu.core_type = #tpu.core_type<tc>, window_params = [{transform_indices = @transform_0, window_bounds = array<i64: 2, 8, 128>}, {pipeline_mode = #tpu.pipeline_mode<synchronous>, transform_indices = @transform_1, window_bounds = array<i64: 128, 384>}, {pipeline_mode = #tpu.pipeline_mode<synchronous>, transform_indices = @transform_2, window_bounds = array<i64: 1, 384>}, {pipeline_mode = #tpu.pipeline_mode<synchronous>, transform_indices = @transform_3, window_bounds = array<i64: 128, 128>}, {pipeline_mode = #tpu.pipeline_mode<synchronous>, transform_indices = @transform_4, window_bounds = array<i64: 1, 128>}, {transform_indices = @transform_5, window_bounds = array<i64: 2, 8, 128>}]} {
    %c0 = arith.constant 0 : index
    %c0_0 = arith.constant 0 : index
    %c0_1 = arith.constant 0 : index
    %0 = vector.load %arg1[%c0, %c0_0, %c0_1] : memref<2x8x128xf32, #tpu.memory_space<vmem>>, vector<2x8x128xf32>
    %1 = vector.shape_cast %0 : vector<2x8x128xf32> to vector<16x128xf32>
    %2 = arith.truncf %1 : vector<16x128xf32> to vector<16x128xbf16>
    %c0_2 = arith.constant 0 : index
    %c0_3 = arith.constant 0 : index
    %3 = vector.load %arg2[%c0_2, %c0_3] : memref<128x384xbf16, #tpu.memory_space<vmem>>, vector<128x384xbf16>
    %cst = arith.constant dense<0.000000e+00> : vector<16x384xf32>
    %4 = tpu.matmul %2, %3, %cst {dimension_numbers = #tpu.dot_dimension_numbers<[1], [0], [0], [1], [0, 0, 1, 1], [], []>} : vector<16x128xbf16>, vector<128x384xbf16>, vector<16x384xf32> -> vector<16x384xf32>
    %c0_4 = arith.constant 0 : index
    %c0_5 = arith.constant 0 : index
    %5 = vector.load %arg3[%c0_4, %c0_5] : memref<1x384xf32, #tpu.memory_space<vmem>>, vector<1x384xf32>
    %6 = vector.broadcast %5 : vector<1x384xf32> to vector<16x384xf32>
    %7 = arith.addf %4, %6 : vector<16x384xf32>
    %8 = arith.truncf %7 : vector<16x384xf32> to vector<16x384xbf16>
    %9 = vector.extract_strided_slice %8 {offsets = [0, 0], sizes = [16, 128], strides = [1, 1]} : vector<16x384xbf16> to vector<16x128xbf16>
    %10 = vector.shape_cast %9 : vector<16x128xbf16> to vector<2x8x128xbf16>
    %11 = vector.extract_strided_slice %8 {offsets = [0, 128], sizes = [16, 128], strides = [1, 1]} : vector<16x384xbf16> to vector<16x128xbf16>
    %12 = vector.shape_cast %11 : vector<16x128xbf16> to vector<2x8x128xbf16>
    %13 = vector.extract_strided_slice %8 {offsets = [0, 256], sizes = [16, 128], strides = [1, 1]} : vector<16x384xbf16> to vector<16x128xbf16>
    %14 = vector.shape_cast %13 : vector<16x128xbf16> to vector<2x8x128xbf16>
    %cst_6 = arith.constant 0.000000e+00 : bf16
    %15 = vector.broadcast %cst_6 : bf16 to vector<2x32x128xbf16>
    %c0_7 = arith.constant 0 : index
    %c0_8 = arith.constant 0 : index
    %c0_9 = arith.constant 0 : index
    %16 = vector.load %arg7[%c0_7, %c0_8, %c0_9] : memref<2x32x128xbf16, #tpu.memory_space<vmem>>, vector<2x32x128xbf16>
    tpu.vector_store %arg7[%c0_7, %c0_8, %c0_9], %15 {strides = array<i32>} : memref<2x32x128xbf16, #tpu.memory_space<vmem>>, vector<2x32x128xbf16>,
    %cst_10 = arith.constant 0.000000e+00 : bf16
    %17 = vector.broadcast %cst_10 : bf16 to vector<2x32x128xbf16>
    %c0_11 = arith.constant 0 : index
    %c0_12 = arith.constant 0 : index
    %c0_13 = arith.constant 0 : index
    %18 = vector.load %arg8[%c0_11, %c0_12, %c0_13] : memref<2x32x128xbf16, #tpu.memory_space<vmem>>, vector<2x32x128xbf16>
    tpu.vector_store %arg8[%c0_11, %c0_12, %c0_13], %17 {strides = array<i32>} : memref<2x32x128xbf16, #tpu.memory_space<vmem>>, vector<2x32x128xbf16>,
    %19 = vector.extract_strided_slice %12 {offsets = [0, 0, 0], sizes = [2, 8, 32], strides = [1, 1, 1]} : vector<2x8x128xbf16> to vector<2x8x32xbf16>
    %c0_14 = arith.constant 0 : index
    %c0_15 = arith.constant 0 : index
    %c0_16 = arith.constant 0 : index
    %20 = vector.load %arg7[%c0_14, %c0_15, %c0_16] : memref<2x32x128xbf16, #tpu.memory_space<vmem>>, vector<2x8x32xbf16>
    tpu.vector_store %arg7[%c0_14, %c0_15, %c0_16], %19 {strides = array<i32>} : memref<2x32x128xbf16, #tpu.memory_space<vmem>>, vector<2x8x32xbf16>,
    %21 = vector.extract_strided_slice %14 {offsets = [0, 0, 0], sizes = [2, 8, 32], strides = [1, 1, 1]} : vector<2x8x128xbf16> to vector<2x8x32xbf16>
    %c0_17 = arith.constant 0 : index
    %c0_18 = arith.constant 0 : index
    %c0_19 = arith.constant 0 : index
    %22 = vector.load %arg8[%c0_17, %c0_18, %c0_19] : memref<2x32x128xbf16, #tpu.memory_space<vmem>>, vector<2x8x32xbf16>
    tpu.vector_store %arg8[%c0_17, %c0_18, %c0_19], %21 {strides = array<i32>} : memref<2x32x128xbf16, #tpu.memory_space<vmem>>, vector<2x8x32xbf16>,
    %23 = vector.extract_strided_slice %12 {offsets = [0, 0, 32], sizes = [2, 8, 32], strides = [1, 1, 1]} : vector<2x8x128xbf16> to vector<2x8x32xbf16>
    %c0_20 = arith.constant 0 : index
    %c8 = arith.constant 8 : index
    %c32 = arith.constant 32 : index
    %24 = vector.load %arg7[%c0_20, %c8, %c32] : memref<2x32x128xbf16, #tpu.memory_space<vmem>>, vector<2x8x32xbf16>
    tpu.vector_store %arg7[%c0_20, %c8, %c32], %23 {strides = array<i32>} : memref<2x32x128xbf16, #tpu.memory_space<vmem>>, vector<2x8x32xbf16>,
    %25 = vector.extract_strided_slice %14 {offsets = [0, 0, 32], sizes = [2, 8, 32], strides = [1, 1, 1]} : vector<2x8x128xbf16> to vector<2x8x32xbf16>
    %c0_21 = arith.constant 0 : index
    %c8_22 = arith.constant 8 : index
    %c32_23 = arith.constant 32 : index
    %26 = vector.load %arg8[%c0_21, %c8_22, %c32_23] : memref<2x32x128xbf16, #tpu.memory_space<vmem>>, vector<2x8x32xbf16>
    tpu.vector_store %arg8[%c0_21, %c8_22, %c32_23], %25 {strides = array<i32>} : memref<2x32x128xbf16, #tpu.memory_space<vmem>>, vector<2x8x32xbf16>,
    %27 = vector.extract_strided_slice %12 {offsets = [0, 0, 64], sizes = [2, 8, 32], strides = [1, 1, 1]} : vector<2x8x128xbf16> to vector<2x8x32xbf16>
    %c0_24 = arith.constant 0 : index
    %c16 = arith.constant 16 : index
    %c64 = arith.constant 64 : index
    %28 = vector.load %arg7[%c0_24, %c16, %c64] : memref<2x32x128xbf16, #tpu.memory_space<vmem>>, vector<2x8x32xbf16>
    tpu.vector_store %arg7[%c0_24, %c16, %c64], %27 {strides = array<i32>} : memref<2x32x128xbf16, #tpu.memory_space<vmem>>, vector<2x8x32xbf16>,
    %29 = vector.extract_strided_slice %14 {offsets = [0, 0, 64], sizes = [2, 8, 32], strides = [1, 1, 1]} : vector<2x8x128xbf16> to vector<2x8x32xbf16>
    %c0_25 = arith.constant 0 : index
    %c16_26 = arith.constant 16 : index
    %c64_27 = arith.constant 64 : index
    %30 = vector.load %arg8[%c0_25, %c16_26, %c64_27] : memref<2x32x128xbf16, #tpu.memory_space<vmem>>, vector<2x8x32xbf16>
    tpu.vector_store %arg8[%c0_25, %c16_26, %c64_27], %29 {strides = array<i32>} : memref<2x32x128xbf16, #tpu.memory_space<vmem>>, vector<2x8x32xbf16>,
    %31 = vector.extract_strided_slice %12 {offsets = [0, 0, 96], sizes = [2, 8, 32], strides = [1, 1, 1]} : vector<2x8x128xbf16> to vector<2x8x32xbf16>
    %c0_28 = arith.constant 0 : index
    %c24 = arith.constant 24 : index
    %c96 = arith.constant 96 : index
    %32 = vector.load %arg7[%c0_28, %c24, %c96] : memref<2x32x128xbf16, #tpu.memory_space<vmem>>, vector<2x8x32xbf16>
    tpu.vector_store %arg7[%c0_28, %c24, %c96], %31 {strides = array<i32>} : memref<2x32x128xbf16, #tpu.memory_space<vmem>>, vector<2x8x32xbf16>,
    %33 = vector.extract_strided_slice %14 {offsets = [0, 0, 96], sizes = [2, 8, 32], strides = [1, 1, 1]} : vector<2x8x128xbf16> to vector<2x8x32xbf16>
    %c0_29 = arith.constant 0 : index
    %c24_30 = arith.constant 24 : index
    %c96_31 = arith.constant 96 : index
    %34 = vector.load %arg8[%c0_29, %c24_30, %c96_31] : memref<2x32x128xbf16, #tpu.memory_space<vmem>>, vector<2x8x32xbf16>
    tpu.vector_store %arg8[%c0_29, %c24_30, %c96_31], %33 {strides = array<i32>} : memref<2x32x128xbf16, #tpu.memory_space<vmem>>, vector<2x8x32xbf16>,
    %c0_32 = arith.constant 0 : index
    %c0_33 = arith.constant 0 : index
    %c0_34 = arith.constant 0 : index
    %35 = vector.load %arg7[%c0_32, %c0_33, %c0_34] : memref<2x32x128xbf16, #tpu.memory_space<vmem>>, vector<2x32x128xbf16>
    "tpu.trace_start"() <{level = 10 : i32, message = "bqd,bjd->bqj"}> : () -> ()
    %cst_35 = arith.constant dense<0.000000e+00> : vector<2x8x32xf32>
    %36 = tpu.matmul %10, %35, %cst_35 {dimension_numbers = #tpu.dot_dimension_numbers<[2], [2], [1], [1], [0, 0, 0, 1, 1, 1], [0], [0]>} : vector<2x8x128xbf16>, vector<2x32x128xbf16>, vector<2x8x32xf32> -> vector<2x8x32xf32>
    "tpu.trace_stop"() : () -> ()
    %37 = vector.extract_strided_slice %36 {offsets = [0, 0, 0], sizes = [2, 8, 8], strides = [1, 1, 1]} : vector<2x8x32xf32> to vector<2x8x8xf32>
    %cst_36 = arith.constant dense<0xFF800000> : vector<2x8xf32>
    %38 = vector.multi_reduction <maximumf>, %37, %cst_36 [2] : vector<2x8x8xf32> to vector<2x8xf32>
    %39 = vector.shape_cast %38 : vector<2x8xf32> to vector<2x8x1xf32>
    %40 = vector.broadcast %39 : vector<2x8x1xf32> to vector<2x8x8xf32>
    %41 = arith.subf %37, %40 : vector<2x8x8xf32>
    %42 = math.exp %41 : vector<2x8x8xf32>
    %cst_37 = arith.constant dense<0.000000e+00> : vector<2x8xf32>
    %43 = vector.multi_reduction <add>, %42, %cst_37 [2] : vector<2x8x8xf32> to vector<2x8xf32>
    %44 = vector.shape_cast %43 : vector<2x8xf32> to vector<2x8x1xf32>
    %45 = tpu.reciprocal %44 {approx = true} : vector<2x8x1xf32> -> vector<2x8x1xf32>
    %46 = vector.broadcast %45 : vector<2x8x1xf32> to vector<2x8x8xf32>
    %47 = arith.mulf %42, %46 : vector<2x8x8xf32>
    %48 = arith.truncf %47 : vector<2x8x8xf32> to vector<2x8x8xbf16>
    %c0_38 = arith.constant 0 : index
    %c0_39 = arith.constant 0 : index
    %c0_40 = arith.constant 0 : index
    %49 = vector.load %arg9[%c0_38, %c0_39, %c0_40] : memref<2x8x32xbf16, #tpu.memory_space<vmem>>, vector<2x8x8xbf16>
    tpu.vector_store %arg9[%c0_38, %c0_39, %c0_40], %48 {strides = array<i32>} : memref<2x8x32xbf16, #tpu.memory_space<vmem>>, vector<2x8x8xbf16>,
    %50 = vector.extract_strided_slice %36 {offsets = [0, 0, 8], sizes = [2, 8, 8], strides = [1, 1, 1]} : vector<2x8x32xf32> to vector<2x8x8xf32>
    %cst_41 = arith.constant dense<0xFF800000> : vector<2x8xf32>
    %51 = vector.multi_reduction <maximumf>, %50, %cst_41 [2] : vector<2x8x8xf32> to vector<2x8xf32>
    %52 = vector.shape_cast %51 : vector<2x8xf32> to vector<2x8x1xf32>
    %53 = vector.broadcast %52 : vector<2x8x1xf32> to vector<2x8x8xf32>
    %54 = arith.subf %50, %53 : vector<2x8x8xf32>
    %55 = math.exp %54 : vector<2x8x8xf32>
    %cst_42 = arith.constant dense<0.000000e+00> : vector<2x8xf32>
    %56 = vector.multi_reduction <add>, %55, %cst_42 [2] : vector<2x8x8xf32> to vector<2x8xf32>
    %57 = vector.shape_cast %56 : vector<2x8xf32> to vector<2x8x1xf32>
    %58 = tpu.reciprocal %57 {approx = true} : vector<2x8x1xf32> -> vector<2x8x1xf32>
    %59 = vector.broadcast %58 : vector<2x8x1xf32> to vector<2x8x8xf32>
    %60 = arith.mulf %55, %59 : vector<2x8x8xf32>
    %61 = arith.truncf %60 : vector<2x8x8xf32> to vector<2x8x8xbf16>
    %c0_43 = arith.constant 0 : index
    %c0_44 = arith.constant 0 : index
    %c8_45 = arith.constant 8 : index
    %62 = vector.load %arg9[%c0_43, %c0_44, %c8_45] : memref<2x8x32xbf16, #tpu.memory_space<vmem>>, vector<2x8x8xbf16>
    tpu.vector_store %arg9[%c0_43, %c0_44, %c8_45], %61 {strides = array<i32>} : memref<2x8x32xbf16, #tpu.memory_space<vmem>>, vector<2x8x8xbf16>,
    %63 = vector.extract_strided_slice %36 {offsets = [0, 0, 16], sizes = [2, 8, 8], strides = [1, 1, 1]} : vector<2x8x32xf32> to vector<2x8x8xf32>
    %cst_46 = arith.constant dense<0xFF800000> : vector<2x8xf32>
    %64 = vector.multi_reduction <maximumf>, %63, %cst_46 [2] : vector<2x8x8xf32> to vector<2x8xf32>
    %65 = vector.shape_cast %64 : vector<2x8xf32> to vector<2x8x1xf32>
    %66 = vector.broadcast %65 : vector<2x8x1xf32> to vector<2x8x8xf32>
    %67 = arith.subf %63, %66 : vector<2x8x8xf32>
    %68 = math.exp %67 : vector<2x8x8xf32>
    %cst_47 = arith.constant dense<0.000000e+00> : vector<2x8xf32>
    %69 = vector.multi_reduction <add>, %68, %cst_47 [2] : vector<2x8x8xf32> to vector<2x8xf32>
    %70 = vector.shape_cast %69 : vector<2x8xf32> to vector<2x8x1xf32>
    %71 = tpu.reciprocal %70 {approx = true} : vector<2x8x1xf32> -> vector<2x8x1xf32>
    %72 = vector.broadcast %71 : vector<2x8x1xf32> to vector<2x8x8xf32>
    %73 = arith.mulf %68, %72 : vector<2x8x8xf32>
    %74 = arith.truncf %73 : vector<2x8x8xf32> to vector<2x8x8xbf16>
    %c0_48 = arith.constant 0 : index
    %c0_49 = arith.constant 0 : index
    %c16_50 = arith.constant 16 : index
    %75 = vector.load %arg9[%c0_48, %c0_49, %c16_50] : memref<2x8x32xbf16, #tpu.memory_space<vmem>>, vector<2x8x8xbf16>
    tpu.vector_store %arg9[%c0_48, %c0_49, %c16_50], %74 {strides = array<i32>} : memref<2x8x32xbf16, #tpu.memory_space<vmem>>, vector<2x8x8xbf16>,
    %76 = vector.extract_strided_slice %36 {offsets = [0, 0, 24], sizes = [2, 8, 8], strides = [1, 1, 1]} : vector<2x8x32xf32> to vector<2x8x8xf32>
    %cst_51 = arith.constant dense<0xFF800000> : vector<2x8xf32>
    %77 = vector.multi_reduction <maximumf>, %76, %cst_51 [2] : vector<2x8x8xf32> to vector<2x8xf32>
    %78 = vector.shape_cast %77 : vector<2x8xf32> to vector<2x8x1xf32>
    %79 = vector.broadcast %78 : vector<2x8x1xf32> to vector<2x8x8xf32>
    %80 = arith.subf %76, %79 : vector<2x8x8xf32>
    %81 = math.exp %80 : vector<2x8x8xf32>
    %cst_52 = arith.constant dense<0.000000e+00> : vector<2x8xf32>
    %82 = vector.multi_reduction <add>, %81, %cst_52 [2] : vector<2x8x8xf32> to vector<2x8xf32>
    %83 = vector.shape_cast %82 : vector<2x8xf32> to vector<2x8x1xf32>
    %84 = tpu.reciprocal %83 {approx = true} : vector<2x8x1xf32> -> vector<2x8x1xf32>
    %85 = vector.broadcast %84 : vector<2x8x1xf32> to vector<2x8x8xf32>
    %86 = arith.mulf %81, %85 : vector<2x8x8xf32>
    %87 = arith.truncf %86 : vector<2x8x8xf32> to vector<2x8x8xbf16>
    %c0_53 = arith.constant 0 : index
    %c0_54 = arith.constant 0 : index
    %c24_55 = arith.constant 24 : index
    %88 = vector.load %arg9[%c0_53, %c0_54, %c24_55] : memref<2x8x32xbf16, #tpu.memory_space<vmem>>, vector<2x8x8xbf16>
    tpu.vector_store %arg9[%c0_53, %c0_54, %c24_55], %87 {strides = array<i32>} : memref<2x8x32xbf16, #tpu.memory_space<vmem>>, vector<2x8x8xbf16>,
    %c0_56 = arith.constant 0 : index
    %c0_57 = arith.constant 0 : index
    %c0_58 = arith.constant 0 : index
    %89 = vector.load %arg9[%c0_56, %c0_57, %c0_58] : memref<2x8x32xbf16, #tpu.memory_space<vmem>>, vector<2x8x32xbf16>
    %c0_59 = arith.constant 0 : index
    %c0_60 = arith.constant 0 : index
    %c0_61 = arith.constant 0 : index
    %90 = vector.load %arg8[%c0_59, %c0_60, %c0_61] : memref<2x32x128xbf16, #tpu.memory_space<vmem>>, vector<2x32x128xbf16>
    "tpu.trace_start"() <{level = 10 : i32, message = "bqj,bjd->bqd"}> : () -> ()
    %cst_62 = arith.constant dense<0.000000e+00> : vector<2x8x128xf32>
    %91 = tpu.matmul %89, %90, %cst_62 {dimension_numbers = #tpu.dot_dimension_numbers<[2], [1], [1], [2], [0, 0, 0, 1, 1, 2], [0], [0]>} : vector<2x8x32xbf16>, vector<2x32x128xbf16>, vector<2x8x128xf32> -> vector<2x8x128xf32>
    "tpu.trace_stop"() : () -> ()
    %92 = vector.shape_cast %91 : vector<2x8x128xf32> to vector<16x128xf32>
    %93 = arith.truncf %92 : vector<16x128xf32> to vector<16x128xbf16>
    %c0_63 = arith.constant 0 : index
    %c0_64 = arith.constant 0 : index
    %94 = vector.load %arg4[%c0_63, %c0_64] : memref<128x128xbf16, #tpu.memory_space<vmem>>, vector<128x128xbf16>
    %cst_65 = arith.constant dense<0.000000e+00> : vector<16x128xf32>
    %95 = tpu.matmul %93, %94, %cst_65 {dimension_numbers = #tpu.dot_dimension_numbers<[1], [0], [0], [1], [0, 0, 1, 1], [], []>} : vector<16x128xbf16>, vector<128x128xbf16>, vector<16x128xf32> -> vector<16x128xf32>
    %c0_66 = arith.constant 0 : index
    %c0_67 = arith.constant 0 : index
    %96 = vector.load %arg5[%c0_66, %c0_67] : memref<1x128xf32, #tpu.memory_space<vmem>>, vector<1x128xf32>
    %97 = vector.broadcast %96 : vector<1x128xf32> to vector<16x128xf32>
    %98 = arith.addf %95, %97 : vector<16x128xf32>
    %99 = vector.shape_cast %98 : vector<16x128xf32> to vector<2x8x128xf32>
    %c0_68 = arith.constant 0 : index
    %c0_69 = arith.constant 0 : index
    %c0_70 = arith.constant 0 : index
    %100 = vector.load %arg6[%c0_68, %c0_69, %c0_70] : memref<2x8x128xf32, #tpu.memory_space<vmem>>, vector<2x8x128xf32>
    tpu.vector_store %arg6[%c0_68, %c0_69, %c0_70], %99 {strides = array<i32>} : memref<2x8x128xf32, #tpu.memory_space<vmem>>, vector<2x8x128xf32>,
    return
  }
  func.func @transform_0(%arg0: i32) -> (i32, i32, i32) {
    %c0_i32 = arith.constant 0 : i32
    %c0_i32_0 = arith.constant 0 : i32
    %c0_i32_1 = arith.constant 0 : i32
    return %arg0, %c0_i32, %c0_i32_0 : i32, i32, i32
  }
  func.func @transform_1(%arg0: i32) -> (i32, i32) {
    %c0_i32 = arith.constant 0 : i32
    %c0_i32_0 = arith.constant 0 : i32
    %c0_i32_1 = arith.constant 0 : i32
    return %c0_i32, %c0_i32_0 : i32, i32
  }
  func.func @transform_2(%arg0: i32) -> (i32, i32) {
    %c0_i32 = arith.constant 0 : i32
    %c0_i32_0 = arith.constant 0 : i32
    %c0_i32_1 = arith.constant 0 : i32
    return %c0_i32, %c0_i32_0 : i32, i32
  }
  func.func @transform_3(%arg0: i32) -> (i32, i32) {
    %c0_i32 = arith.constant 0 : i32
    %c0_i32_0 = arith.constant 0 : i32
    %c0_i32_1 = arith.constant 0 : i32
    return %c0_i32, %c0_i32_0 : i32, i32
  }
  func.func @transform_4(%arg0: i32) -> (i32, i32) {
    %c0_i32 = arith.constant 0 : i32
    %c0_i32_0 = arith.constant 0 : i32
    %c0_i32_1 = arith.constant 0 : i32
    return %c0_i32, %c0_i32_0 : i32, i32
  }
  func.func @transform_5(%arg0: i32) -> (i32, i32, i32) {
    %c0_i32 = arith.constant 0 : i32
    %c0_i32_0 = arith.constant 0 : i32
    %c0_i32_1 = arith.constant 0 : i32
    return %arg0, %c0_i32, %c0_i32_0 : i32, i32, i32
  }
}

</mosaic_0001>

<bundles_post_ra>
// kernel: tpu_custom_call.1
= control target key start
LH: loop header
LB: loop body
LE: loop exit
PB: predicated region body
PF: predicated region fallthrough
CT: control target
= control target key end

     0   :  { %10 = vsyncpa [#allocation6], 0  ;;  %s1408_s0 = inlined_call_operand.hbm [shape: f32[2,8,128], index: 0, kind: input, shape index: {}]   ;;  %s1409_s1 = inlined_call_operand.hbm [shape: bf16[128,384], index: 1, kind: input, shape index: {}]   ;;  %s1410_s2 = inlined_call_operand.vmem [shape: f32[1,384], index: 2, kind: input, shape index: {}]   ;;  %s1411_s3 = inlined_call_operand.hbm [shape: bf16[128,128], index: 3, kind: input, shape index: {}]   ;;  %s1412_s4 = inlined_call_operand.vmem [shape: f32[1,128], index: 4, kind: input, shape index: {}]   ;;  %s1413_s5 = inlined_call_operand.hbm [shape: f32[2,8,128], index: 5, kind: output, shape index: {}]  }
   0x1   :  { %11 = vsyncpa [#allocation9], 0 }
   0x2   :  { %12 = vsyncpa [#allocation7], 0  ;;  %s1228_s18 = smov [#allocation8]  }
   0x3   :  { %s30_s19 = sshll.u32 %s1228_s18, 4  ;;  %s31_s19 = int_to_ptr.vmem [resolvable:$true] %s30_s19 }
   0x4   :  { %s1150_s20 = scalar_lea.vmem %s31_s19, 3072  ;;  %p1155_p1 = scmp.lt.s32.totalorder %s31_s19, %s31_s19 }
   0x5   :  { %p1151_p0 = scmp.ne.s32.totalorder %s31_s19, %s1150_s20  ;;  %p1156_p2 = scmp.lt.s32.totalorder %s1150_s20, %s1150_s20 }
   0x7   :  { %p1157_p3 = por %p1156_p2, %p1155_p1 }
   0x9   :  { %p1158_p4 = pnand %p1157_p3, %p1151_p0 }
   0xb   :  { %1161 = shalt.err (!%p1158_p4)
}
   0xc   :  { %s1229_s21 = smov 192   ;;  %s1230_s22 = smov 12  }
   0xd   :  { %36 = dma.hbm_to_vmem [thread:$0]  %s1409_s1, 3072, %s31_s19, [#allocation9], %s1229_s21, %s1229_s21, %s1230_s22  }
   0xe   :  { %s1231_s25 = smov [#allocation5]  }
   0xf   :  { %s18_s26 = sshll.u32 %s1231_s25, 4  ;;  %s19_s26 = int_to_ptr.vmem [resolvable:$true] %s18_s26 }
  0x10   :  { %s1170_s27 = scalar_lea.vmem %s19_s26, 256  ;;  %p1175_p6 = scmp.lt.s32.totalorder %s19_s26, %s19_s26 }
  0x11   :  { %p1171_p5 = scmp.ne.s32.totalorder %s19_s26, %s1170_s27  ;;  %p1176_p7 = scmp.lt.s32.totalorder %s1170_s27, %s1170_s27 }
  0x13   :  { %p1177_p8 = por %p1176_p7, %p1175_p6 }
  0x15   :  { %p1178_p9 = pnand %p1177_p8, %p1171_p5 }
  0x17   :  { %1181 = shalt.err (!%p1178_p9)
}
  0x18   :  { %s1232_s28 = smov 128   ;;  %s1233_s29 = smov 8  }
  0x19   :  { %24 = dma.hbm_to_vmem [thread:$0]  %s1408_s0, 256, %s19_s26, [#allocation6], %s1232_s28, %s1232_s28, %s1233_s29  }
  0x1a   :  { %s1234_s1 = smov [#allocation10]  }
  0x1b   :  { %s44_s7 = sshll.u32 %s1234_s1, 4  ;;  %s45_s7 = int_to_ptr.vmem [resolvable:$true] %s44_s7 }
  0x1c   :  { %s1190_s8 = scalar_lea.vmem %s45_s7, 1024  ;;  %p1195_p11 = scmp.lt.s32.totalorder %s45_s7, %s45_s7 }
  0x1d   :  { %p1191_p10 = scmp.ne.s32.totalorder %s45_s7, %s1190_s8  ;;  %p1196_p12 = scmp.lt.s32.totalorder %s1190_s8, %s1190_s8 }
  0x1f   :  { %p1197_p13 = por %p1196_p12, %p1195_p11 }
  0x21   :  { %p1198_p0 = pnand %p1197_p13, %p1191_p10 }
  0x23   :  { %1201 = shalt.err (!%p1198_p0)
}
  0x24   :  { %s1235_s9 = smov 64   ;;  %s1236_s10 = smov 4  }
  0x25   :  { %50 = dma.hbm_to_vmem [thread:$0]  %s1411_s3, 1024, %s45_s7, [#allocation9], %s1235_s9, %s1235_s9, %s1236_s10  }
  0x26   :  { %1222 = dma.done.wait [#allocation6], 256  }
  0x27   :  { %1223 = vsyncadd [#allocation6], 4294967040 }
  0x28   :  { %1224 = dma.done.wait [#allocation9], 4096  }
  0x29   :  { %1225 = vsyncadd [#allocation9], 4294963200  ;;  %v1237_v0 = vmov 0   ;;  %v1238_v1 = vmov 0.0   ;;  %v1062_v2 = vld [vmem:[#allocation8 + $0xac] ss:$12 sps:$4 sm:$0xff]   ;;  %v100_v29 = vlaneseq }
  0x2a   :  { %275 = vmatprep.mubr.bf16.mxu0 %v1237_v0  ;;  %351 = vst [vmem:[#allocation2] sm:$0xf] %v1237_v0  ;;  %352 = vst [vmem:[#allocation2 + $0x4] sm:$0xf] %v1237_v0  ;;  %974 = vmatprep.subr.bf16.mxu1 %v1238_v1  ;;  %v1064_v3 = vld [vmem:[#allocation8 + $0xa8] ss:$12 sps:$4 sm:$0xff]  }
  0x2b   :  { %353 = vst [vmem:[#allocation2 + $0x8] sm:$0xf] %v1237_v0  ;;  %354 = vst [vmem:[#allocation2 + $0xc] sm:$0xf] %v1237_v0  ;;  %243 = vmatprep.subr.bf16.mxu0 %v1062_v2  ;;  %v1065_v4 = vld [vmem:[#allocation8 + $0x94] ss:$12 sps:$4 sm:$0xff]  }
  0x2c   :  { %355 = vst [vmem:[#allocation2 + $0x10] sm:$0xf] %v1237_v0  ;;  %356 = vst [vmem:[#allocation2 + $0x14] sm:$0xf] %v1237_v0  ;;  %244 = vmatpush1.bf16.msra.mxu0 %v1064_v3  ;;  %v1067_v5 = vld [vmem:[#allocation8 + $0x90] ss:$12 sps:$4 sm:$0xff]  }
  0x2d   :  { %357 = vst [vmem:[#allocation2 + $0x18] sm:$0xf] %v1237_v0  ;;  %358 = vst [vmem:[#allocation2 + $0x1c] sm:$0xf] %v1237_v0  ;;  %245 = vmatprep.subr.bf16.mxu0 %v1065_v4  ;;  %v1068_v6 = vld [vmem:[#allocation8 + $0x7c] ss:$12 sps:$4 sm:$0xff]  }
  0x2e   :  { %359 = vst [vmem:[#allocation3] sm:$0xf] %v1237_v0  ;;  %360 = vst [vmem:[#allocation3 + $0x4] sm:$0xf] %v1237_v0  ;;  %v1070_v7 = vld [vmem:[#allocation8 + $0x78] ss:$12 sps:$4 sm:$0xff]  }
  0x2f   :  { %361 = vst [vmem:[#allocation3 + $0x8] sm:$0xf] %v1237_v0  ;;  %362 = vst [vmem:[#allocation3 + $0xc] sm:$0xf] %v1237_v0  ;;  %v1071_v8 = vld [vmem:[#allocation8 + $0x64] ss:$12 sps:$4 sm:$0xff]  }
  0x30   :  { %363 = vst [vmem:[#allocation3 + $0x10] sm:$0xf] %v1237_v0  ;;  %364 = vst [vmem:[#allocation3 + $0x14] sm:$0xf] %v1237_v0  ;;  %246 = vmatpush1.bf16.msra.mxu0 %v1067_v5  ;;  %v1073_v9 = vld [vmem:[#allocation8 + $0x60] ss:$12 sps:$4 sm:$0xff]  }
  0x31   :  { %365 = vst [vmem:[#allocation3 + $0x18] sm:$0xf] %v1237_v0  ;;  %366 = vst [vmem:[#allocation3 + $0x1c] sm:$0xf] %v1237_v0  ;;  %247 = vmatprep.subr.bf16.mxu0 %v1068_v6  ;;  %v1074_v10 = vld [vmem:[#allocation8 + $0x4c] ss:$12 sps:$4 sm:$0xff]  }
  0x32   :  { %v1086_v11 = vld [vmem:[#allocation8 + $0xb0] ss:$12 sps:$4 sm:$0xff]   ;;  %v1087_v12 = vld [vmem:[#allocation8 + $0x98] ss:$12 sps:$4 sm:$0xff]   ;;  %v1076_v13 = vld [vmem:[#allocation8 + $0x48] ss:$12 sps:$4 sm:$0xff]  }
  0x33   :  { %975 = vmatpush3.bf16.msra.mxu1 %v1086_v11  ;;  %v1077_v14 = vld [vmem:[#allocation8 + $0x34] ss:$12 sps:$4 sm:$0xff]   ;;  %v1079_v15 = vld [vmem:[#allocation8 + $0x30] ss:$12 sps:$4 sm:$0xff]   ;;  %v1082_v19 = vld [vmem:[#allocation8 + $0x18] ss:$12 sps:$4 sm:$0xff]  }
  0x34   :  { %248 = vmatpush1.bf16.msra.mxu0 %v1070_v7  ;;  %976 = vmatprep.subr.bf16.mxu1 %v1238_v1  ;;  %v1088_v16 = vld [vmem:[#allocation8 + $0x80] ss:$12 sps:$4 sm:$0xff]   ;;  %v1080_v17 = vld [vmem:[#allocation8 + $0x1c] ss:$12 sps:$4 sm:$0xff]   ;;  %v1083_v20 = vld [vmem:[#allocation8 + $0x4] ss:$12 sps:$4 sm:$0xff]  }
  0x35   :  { %249 = vmatprep.subr.bf16.mxu0 %v1071_v8  ;;  %v1089_v18 = vld [vmem:[#allocation8 + $0x68] ss:$12 sps:$4 sm:$0xff]   ;;  %v1090_v21 = vld [vmem:[#allocation8 + $0x50] ss:$12 sps:$4 sm:$0xff]   ;;  %v1085_v22 = vld [vmem:[#allocation8] ss:$12 sps:$4 sm:$0xff]  }
  0x36   :  { %v63_v23 = vld [vmem:[#allocation5] sm:$0xff]  ;;  %v64_v24 = vld [vmem:[#allocation5 + $0x8] sm:$0xff]  ;;  %v1092_v27 = vld [vmem:[#allocation8 + $0x20] ss:$12 sps:$4 sm:$0xff]   ;;  %vm1239_vm0 = vmmov 0   ;;  %v101_v30 = vshrl.u32 %v100_v29, 7 }
  0x37   :  { %977 = vmatpush3.bf16.msra.mxu1 %v1087_v12  ;;  %v65_v25 = vpack.c.bf16 %v64_v24, %v63_v23  ;;  %v1091_v26 = vld [vmem:[#allocation8 + $0x38] ss:$12 sps:$4 sm:$0xff]   ;;  %v1093_v28 = vld [vmem:[#allocation8 + $0x8] ss:$12 sps:$4 sm:$0xff]   ;;  %990 = vmatprep.mubr.msk.bf16.mxu1 %vm1239_vm0, %v1238_v1  ;;  %vm367_vm1 = vcmask 257024   ;;  %vm372_vm2 = vcmask 519424  }
  0x38   :  { %250 = vmatpush1.bf16.msra.mxu0 %v1073_v9  ;;  %978 = vmatprep.subr.bf16.mxu1 %v1238_v1  ;;  %v106_v31 = vsub.s32 1, %v101_v30  ;;  %v98_v32 = vld [vmem:[%s1410_s2] sm:$0x7]  ;;  %vm377_vm3 = vcmask 781824   ;;  %vm382_vm4 = vcmask 1044224   ;;  %v102_v43 = vsub.s32 0, %v101_v30 }
  0x39   :  { %251 = vmatprep.subr.bf16.mxu0 %v1074_v10  ;;  %v110_v52 = vsub.s32 2, %v101_v30  ;;  %vm563_vm5 = vcmask 195712   ;;  %vm527_vm6 = vcmask 130112   ;;  %vm599_vm7 = vcmask 261312   ;;  %s1240_s2 = smov 112   ;;  %s1241_s13 = smov 120  }
  0x3a   :  { %v107_v33 = vrot.slane %v98_v32, %v106_v31  ;;  %v103_v44 = vrot.slane %v98_v32, %v102_v43  ;;  %vm499_vm8 = vcmask 64512   ;;  %s1242_s14 = smov 104   ;;  %vm524_vm9 = vcmask 60416   ;;  %s1243_s17 = smov [#allocation11]  }
  0x3b   :  { %979 = vmatpush3.bf16.msra.mxu1 %v1088_v16  ;;  %v111_v53 = vrot.slane %v98_v32, %v110_v52  ;;  %vm560_vm10 = vcmask 126016   ;;  %vm596_vm11 = vcmask 191616   ;;  %vm632_vm12 = vcmask 257216   ;;  %s876_s18 = sshll.u32 %s1243_s17, 4  ;;  %s877_s18 = int_to_ptr.vmem [resolvable:$true] %s876_s18 }
  0x3c   :  { %252 = vmatpush1.bf16.msra.mxu0 %v1076_v13  ;;  %980 = vmatprep.subr.bf16.mxu1 %v1238_v1  ;;  %vm657_vm13 = vcmask 261120   ;;  %s1202_s19 = scalar_lea.vmem %s877_s18, 256  ;;  %p1207_p2 = scmp.lt.s32.totalorder %s877_s18, %s877_s18 }
  0x3d   :  { %253 = vmatprep.subr.bf16.mxu0 %v1077_v14  ;;  %p1203_p1 = scmp.ne.s32.totalorder %s877_s18, %s1202_s19  ;;  %p1208_p3 = scmp.lt.s32.totalorder %s1202_s19, %s1202_s19 }
  0x3f   :  { %981 = vmatpush3.bf16.msra.mxu1 %v1089_v18  ;;  %p1209_p4 = por %p1208_p3, %p1207_p2 }
  0x40   :  { %254 = vmatpush1.bf16.msra.mxu0 %v1079_v15  ;;  %982 = vmatprep.subr.bf16.mxu1 %v1238_v1 }
  0x41   :  { %255 = vmatprep.subr.bf16.mxu0 %v1080_v17  ;;  %p1210_p5 = pnand %p1209_p4, %p1203_p1 }
  0x43   :  { %983 = vmatpush3.bf16.msra.mxu1 %v1090_v21 }
  0x44   :  { %256 = vmatpush1.bf16.msra.mxu0 %v1082_v19  ;;  %984 = vmatprep.subr.bf16.mxu1 %v1238_v1 }
  0x45   :  { %257 = vmatprep.subr.bf16.mxu0 %v1083_v20 }
  0x47   :  { %985 = vmatpush3.bf16.msra.mxu1 %v1091_v26 }
  0x48   :  { %258 = vmatpush1.bf16.msra.mxu0 %v1085_v22  ;;  %986 = vmatprep.subr.bf16.mxu1 %v1238_v1 }
  0x49   :  { %1010 = vmatprep.subr.bf16.mxu0 %v1238_v1 }
  0x4b   :  { %276 = vmatmul.mubr.bf16.vlgmr.msra.gmra.mxu0 %v65_v25  ;;  %987 = vmatpush3.bf16.msra.mxu1 %v1092_v27 }
  0x4c   :  { %988 = vmatprep.subr.bf16.mxu1 %v1238_v1  ;;  %1014 = vmatprep.mubr.msk.bf16.mxu0 %vm1239_vm0, %v1238_v1 }
  0x4f   :  { %989 = vmatpush3.bf16.msra.mxu1 %v1093_v28 }
  0x50   :  { %994 = vmatprep.subr.bf16.mxu1 %v1238_v1 }
  0x52   :  { %991 = vmatmul.mubr.bf16.vlgmr.msra.gmra.mxu1 %v65_v25 }
  0x53   :  { %998 = vmatprep.mubr.msk.bf16.mxu1 %vm1239_vm0, %v1238_v1 }
 0x10b   :  { %v277_v34 = vpop.f32.mrf.mxu0 }
 0x10c   :  { %v278_v46 = vadd.f32 %v277_v34, %v103_v44 }
 0x10d   :  { %v279_v35 = vpop.f32.mrf.mxu0 }
 0x10e   :  { %v280_v36 = vadd.f32 %v279_v35, %v107_v33  ;;  %v938_v47 = vpack.c.bf16 %v278_v46, %v278_v46 }
 0x10f   :  { %v281_v37 = vpop.f32.mrf.mxu0 }
 0x110   :  { %v940_v38 = vpack.c.bf16 %v280_v36, %v280_v36  ;;  %v282_v50 = vadd.f32 %v281_v37, %v103_v44 }
 0x111   :  { %v283_v39 = vpop.f32.mrf.mxu0 }
 0x112   :  { %368 = vst.msk [vmem:[#allocation2] sm:$0xf] %vm367_vm1, %v940_v38  ;;  %v284_v40 = vadd.f32 %v283_v39, %v107_v33  ;;  %v939_v51 = vpack.c.bf16 %v282_v50, %v282_v50  ;;  %v320_v54 = vpop.f32.mrf.mxu1 }
 0x113   :  { %373 = vst.msk [vmem:[#allocation2 + $0x4] sm:$0xf] %vm372_vm2, %v940_v38  ;;  %v321_v55 = vadd.f32 %v320_v54, %v111_v53 }
 0x114   :  { %378 = vst.msk [vmem:[#allocation2 + $0x8] sm:$0xf] %vm377_vm3, %v940_v38  ;;  %v941_v41 = vpack.c.bf16 %v284_v40, %v284_v40  ;;  %v992_v56 = vpop.f32.mrf.mxu1 }
 0x115   :  { %383 = vst.msk [vmem:[#allocation2 + $0xc] sm:$0xf] %vm382_vm4, %v940_v38  ;;  %v942_v57 = vpack.c.bf16 %v321_v55, %v321_v55 }
 0x116   :  { %369 = vst.msk [vmem:[#allocation2 + $0x10] sm:$0xf] %vm367_vm1, %v941_v41  ;;  %v323_v58 = vpop.f32.mrf.mxu1 }
 0x117   :  { %374 = vst.msk [vmem:[#allocation2 + $0x14] sm:$0xf] %vm372_vm2, %v941_v41  ;;  %375 = vst.msk [vmem:[#allocation3 + $0x4] sm:$0xf] %vm372_vm2, %v942_v57  ;;  %v324_v59 = vadd.f32 %v323_v58, %v111_v53 }
 0x118   :  { %379 = vst.msk [vmem:[#allocation2 + $0x18] sm:$0xf] %vm377_vm3, %v941_v41  ;;  %380 = vst.msk [vmem:[#allocation3 + $0x8] sm:$0xf] %vm377_vm3, %v942_v57  ;;  %v993_v60 = vpop.f32.mrf.mxu1 }
 0x119   :  { %384 = vst.msk [vmem:[#allocation2 + $0x1c] sm:$0xf] %vm382_vm4, %v941_v41  ;;  %385 = vst.msk [vmem:[#allocation3 + $0xc] sm:$0xf] %vm382_vm4, %v942_v57  ;;  %v943_v61 = vpack.c.bf16 %v324_v59, %v324_v59 }
 0x11a   :  { %v1095_v45 = vld [vmem:[#allocation2] sm:$0xff]   ;;  %370 = vst.msk [vmem:[#allocation3] sm:$0xf] %vm367_vm1, %v942_v57 }
 0x11b   :  { %371 = vst.msk [vmem:[#allocation3 + $0x10] sm:$0xf] %vm367_vm1, %v943_v61 }
 0x11c   :  { %v1094_v42 = vld [vmem:[#allocation2 + $0x8] sm:$0xff]   ;;  %376 = vst.msk [vmem:[#allocation3 + $0x14] sm:$0xf] %vm372_vm2, %v943_v61 }
 0x11d   :  { %995 = vmatpush3.bf16.xpose.msra.mxu1 %v1094_v42  ;;  %381 = vst.msk [vmem:[#allocation3 + $0x18] sm:$0xf] %vm377_vm3, %v943_v61 }
 0x11e   :  { %996 = vmatprep.subr.bf16.mxu1 %v1238_v1  ;;  %v1097_v49 = vld [vmem:[#allocation2 + $0x10] sm:$0xff]   ;;  %386 = vst.msk [vmem:[#allocation3 + $0x1c] sm:$0xf] %vm382_vm4, %v943_v61 }
 0x120   :  { %v1096_v48 = vld [vmem:[#allocation2 + $0x18] sm:$0xff]   ;;  %v1098_v62 = vld [vmem:[#allocation3 + $0x8] sm:$0xff]  }
 0x121   :  { %1011 = vmatpush3.bf16.msra.mxu0 %v1098_v62  ;;  %v1100_v0 = vld [vmem:[#allocation3] sm:$0xff]  }
 0x122   :  { %1012 = vmatprep.subr.bf16.mxu0 %v1238_v1 }
 0x123   :  { %v1101_v2 = vld [vmem:[#allocation3 + $0x10] sm:$0xff]  }
 0x125   :  { %997 = vmatpush3.bf16.xpose.msra.mxu1 %v1095_v45  ;;  %v1099_v63 = vld [vmem:[#allocation3 + $0x18] sm:$0xff]   ;;  %1013 = vmatpush3.bf16.msra.mxu0 %v1100_v0 }
 0x126   :  { %1002 = vmatprep.subr.bf16.mxu1 %v1238_v1  ;;  %1026 = vmatprep.subr.bf16.mxu0 %v1238_v1 }
 0x12c   :  { %999 = vmatmul.mubr.bf16.vlgmr.msra.gmra.mxu1 %v938_v47 }
 0x12d   :  { %1003 = vmatpush3.bf16.xpose.msra.mxu1 %v1096_v48  ;;  %1006 = vmatprep.mubr.msk.bf16.mxu1 %vm1239_vm0, %v1238_v1 }
 0x12e   :  { %1004 = vmatprep.subr.bf16.mxu1 %v1238_v1 }
 0x135   :  { %1005 = vmatpush3.bf16.xpose.msra.mxu1 %v1097_v49 }
 0x136   :  { %1018 = vmatprep.subr.bf16.mxu1 %v1238_v1 }
 0x13c   :  { %1007 = vmatmul.mubr.bf16.vlgmr.msra.gmra.mxu1 %v939_v51 }
 0x13d   :  { %1022 = vmatprep.mubr.msk.bf16.mxu1 %vm1239_vm0, %v1238_v1  ;;  %1019 = vmatpush3.bf16.msra.mxu1 %v1099_v63 }
 0x13e   :  { %1020 = vmatprep.subr.bf16.mxu1 %v1238_v1 }
 0x141   :  { %1021 = vmatpush3.bf16.msra.mxu1 %v1101_v2 }
 0x1ec   :  { %v1332_v3 = vpop.f32.mrf.mxu1 }
 0x1ed   :  { %v564_v4 = vsel %vm563_vm5, %v1332_v3, -inf  ;;  %v528_v5 = vsel %vm527_vm6, %v1332_v3, -inf  ;;  %v600_v15 = vsel %vm599_vm7, %v1332_v3, -inf  ;;  %v500_v17 = vsel %vm499_vm8, %v1332_v3, -inf }
 0x1ee   :  { %565 = vmax.xlane.f32.xlu1 %v564_v4  ;;  %529 = vmax.xlane.f32.xlu0 %v528_v5  ;;  %v1000_v6 = vpop.f32.mrf.mxu1 }
 0x1f0   :  { %v444_v7 = vpop.f32.mrf.mxu1 }
 0x1f2   :  { %v1001_v8 = vpop.f32.mrf.mxu1 }
 0x1fc   :  { %v1336_v9 = vpop.f32.mrf.mxu1 }
 0x1fd   :  { %v567_v10 = vsel %vm563_vm5, %v1336_v9, -inf  ;;  %v531_v11 = vsel %vm527_vm6, %v1336_v9, -inf  ;;  %v603_v14 = vsel %vm599_vm7, %v1336_v9, -inf  ;;  %v503_v18 = vsel %vm499_vm8, %v1336_v9, -inf }
 0x1fe   :  { %568 = vmax.xlane.f32.xlu1 %v567_v10  ;;  %532 = vmax.xlane.f32.xlu0 %v531_v11  ;;  %v1008_v12 = vpop.f32.mrf.mxu1 }
 0x200   :  { %v496_v13 = vpop.f32.mrf.mxu1 }
 0x202   :  { %604 = vmax.xlane.f32.xlu1 %v603_v14  ;;  %601 = vmax.xlane.f32.xlu0 %v600_v15  ;;  %v1009_v16 = vpop.f32.mrf.mxu1 }
 0x206   :  { %501 = vmax.xlane.f32.xlu0 %v500_v17  ;;  %504 = vmax.xlane.f32.xlu1 %v503_v18 }
 0x277   :  { %v566_v19 = vpop.xlane.xlu1 %565  ;;  %v530_v20 = vpop.xlane.xlu0 %529 }
 0x278   :  { %v570_v21 = vsub.f32 %v1332_v3, %v566_v19  ;;  %v534_v22 = vsub.f32 %v1332_v3, %v530_v20 }
 0x27a   :  { %v572_v23 = vmul.f32 1.442695, %v570_v21  ;;  %v536_v24 = vmul.f32 1.442695, %v534_v22 }
 0x27c   :  { %1110 = vpow2.f32 %v572_v23 }
 0x27d   :  { %1112 = vpow2.f32 %v536_v24 }
 0x287   :  { %v569_v25 = vpop.xlane.xlu1 %568  ;;  %v533_v26 = vpop.xlane.xlu0 %532 }
 0x288   :  { %v571_v27 = vsub.f32 %v1336_v9, %v569_v25  ;;  %v535_v28 = vsub.f32 %v1336_v9, %v533_v26 }
 0x289   :  { %v1350_v29 = vpop.eup %1110 }
 0x28a   :  { %v1352_v30 = vpop.eup %1112  ;;  %v538_v31 = vmul.f32 1.442695, %v535_v28  ;;  %578 = vrot.lane.b32.xlu1 %v1350_v29, %s1240_s2  ;;  %v574_v34 = vmul.f32 1.442695, %v571_v27 }
 0x28b   :  { %542 = vrot.lane.b32.xlu0 %v1352_v30, %s1241_s13  ;;  %v605_v32 = vpop.xlane.xlu1 %604  ;;  %v602_v33 = vpop.xlane.xlu0 %601 }
 0x28c   :  { %v606_v35 = vsub.f32 %v1332_v3, %v602_v33  ;;  %1114 = vpow2.f32 %v538_v31  ;;  %v607_v36 = vsub.f32 %v1336_v9, %v605_v32 }
 0x28d   :  { %1116 = vpow2.f32 %v574_v34  ;;  %v1102_v34 = vld [vmem:[#allocation10 + $0x38] sm:$0xff]  }
 0x28e   :  { %v608_v37 = vmul.f32 1.442695, %v606_v35  ;;  %v610_v38 = vmul.f32 1.442695, %v607_v36  ;;  %v1103_v36 = vld [vmem:[#allocation10 + $0x30] sm:$0xff]  }
 0x28f   :  { %v502_v43 = vpop.xlane.xlu0 %501  ;;  %v505_v46 = vpop.xlane.xlu1 %504 }
 0x290   :  { %1118 = vpow2.f32 %v608_v37  ;;  %v506_v44 = vsub.f32 %v1332_v3, %v502_v43  ;;  %v507_v47 = vsub.f32 %v1336_v9, %v505_v46  ;;  %v1109_v43 = vld [vmem:[#allocation10] sm:$0xff]  }
 0x291   :  { %1120 = vpow2.f32 %v610_v38  ;;  %v1104_v38 = vld [vmem:[#allocation10 + $0x28] sm:$0xff]  }
 0x292   :  { %v508_v45 = vmul.f32 1.442695, %v506_v44  ;;  %v510_v48 = vmul.f32 1.442695, %v507_v47 }
 0x294   :  { %1122 = vpow2.f32 %v508_v45 }
 0x295   :  { %1124 = vpow2.f32 %v510_v48 }
 0x299   :  { %v1358_v39 = vpop.eup %1114 }
 0x29a   :  { %544 = vrot.lane.b32.xlu1 %v1358_v39, %s1241_s13  ;;  %v1361_v40 = vpop.eup %1116 }
 0x29d   :  { %v1363_v41 = vpop.eup %1118 }
 0x29e   :  { %614 = vrot.lane.b32.xlu0 %v1363_v41, %s1242_s14  ;;  %580 = vrot.lane.b32.xlu1 %v1361_v40, %s1240_s2  ;;  %v1367_v42 = vpop.eup %1120 }
 0x2a1   :  { %v1123_v49 = vpop.eup %1122 }
 0x2a2   :  { %616 = vrot.lane.b32.xlu1 %v1367_v42, %s1242_s14  ;;  %v512_v50 = vsel %vm499_vm8, %v1123_v49, 0.0  ;;  %v1125_v51 = vpop.eup %1124 }
 0x2a3   :  { %v515_v52 = vsel %vm499_vm8, %v1125_v51, 0.0 }
 0x2bd   :  { %513 = vadd.xlane.f32.xlu0 %v512_v50 }
 0x2c6   :  { %516 = vadd.xlane.f32.xlu1 %v515_v52 }
 0x2fc   :  { %v579_v55 = vpop.permute.xlu1 %578 }
 0x2fd   :  { %v543_v53 = vpop.permute.xlu0 %542  ;;  %v584_v56 = vsel %vm499_vm8, %v579_v55, 0.0 }
 0x2fe   :  { %v548_v54 = vsel %vm499_vm8, %v543_v53, 0.0  ;;  %v929_v53 = vld [vmem:[%s1412_s4] ss:$0 sm:$0xff] }
 0x2ff   :  { %549 = vadd.xlane.f32.xlu0 %v548_v54 }
 0x303   :  { %585 = vadd.xlane.f32.xlu0 %v584_v56 }
 0x30c   :  { %v545_v57 = vpop.permute.xlu1 %544 }
 0x30d   :  { %v551_v58 = vsel %vm499_vm8, %v545_v57, 0.0 }
 0x30e   :  { %552 = vadd.xlane.f32.xlu0 %v551_v58 }
 0x310   :  { %v615_v59 = vpop.permute.xlu0 %614  ;;  %v581_v60 = vpop.permute.xlu1 %580 }
 0x311   :  { %v620_v61 = vsel %vm499_vm8, %v615_v59, 0.0  ;;  %v587_v62 = vsel %vm499_vm8, %v581_v60, 0.0 }
 0x312   :  { %621 = vadd.xlane.f32.xlu0 %v620_v61  ;;  %588 = vadd.xlane.f32.xlu1 %v587_v62 }
 0x314   :  { %v617_v63 = vpop.permute.xlu1 %616 }
 0x315   :  { %v623_v0 = vsel %vm499_vm8, %v617_v63, 0.0 }
 0x316   :  { %624 = vadd.xlane.f32.xlu1 %v623_v0 }
 0x346   :  { %v514_v2 = vpop.xlane.xlu0 %513 }
 0x347   :  { %1126 = vrcp.f32 %v514_v2 }
 0x34f   :  { %v517_v3 = vpop.xlane.xlu1 %516 }
 0x350   :  { %1128 = vrcp.f32 %v517_v3 }
 0x354   :  { %v1127_v4 = vpop.eup %1126 }
 0x355   :  { %v520_v5 = vmul.f32 %v1127_v4, %v1123_v49 }
 0x357   :  { %v522_v6 = vpack.c.bf16 %v520_v5, %v520_v5 }
 0x359   :  { %525 = vst.msk [vmem:[#allocation4] sm:$0xf] %vm524_vm9, %v522_v6 }
 0x35d   :  { %v1129_v7 = vpop.eup %1128 }
 0x35e   :  { %v521_v8 = vmul.f32 %v1129_v7, %v1125_v51 }
 0x360   :  { %v523_v9 = vpack.c.bf16 %v521_v8, %v521_v8 }
 0x362   :  { %526 = vst.msk [vmem:[#allocation4 + $0x4] sm:$0xf] %vm524_vm9, %v523_v9 }
 0x388   :  { %v550_v10 = vpop.xlane.xlu0 %549 }
 0x389   :  { %1130 = vrcp.f32 %v550_v10 }
 0x38c   :  { %v586_v11 = vpop.xlane.xlu0 %585 }
 0x38d   :  { %1132 = vrcp.f32 %v586_v11 }
 0x396   :  { %v1131_v12 = vpop.eup %1130 }
 0x397   :  { %v556_v13 = vmul.f32 %v1131_v12, %v1352_v30  ;;  %v553_v14 = vpop.xlane.xlu0 %552 }
 0x398   :  { %1134 = vrcp.f32 %v553_v14 }
 0x399   :  { %v558_v15 = vpack.c.bf16 %v556_v13, %v556_v13 }
 0x39a   :  { %v1133_v16 = vpop.eup %1132 }
 0x39b   :  { %561 = vst.msk [vmem:[#allocation4] sm:$0xf] %vm560_vm10, %v558_v15  ;;  %v592_v17 = vmul.f32 %v1133_v16, %v1350_v29  ;;  %v622_v18 = vpop.xlane.xlu0 %621  ;;  %v589_v19 = vpop.xlane.xlu1 %588 }
 0x39c   :  { %1136 = vrcp.f32 %v622_v18 }
 0x39d   :  { %v594_v20 = vpack.c.bf16 %v592_v17, %v592_v17  ;;  %1138 = vrcp.f32 %v589_v19 }
 0x39f   :  { %597 = vst.msk [vmem:[#allocation4] sm:$0xf] %vm596_vm11, %v594_v20  ;;  %v625_v21 = vpop.xlane.xlu1 %624 }
 0x3a0   :  { %1140 = vrcp.f32 %v625_v21 }
 0x3a5   :  { %v1135_v22 = vpop.eup %1134 }
 0x3a6   :  { %v557_v23 = vmul.f32 %v1135_v22, %v1358_v39  ;;  %v1105_v39 = vld [vmem:[#allocation10 + $0x20] sm:$0xff]  }
 0x3a8   :  { %v559_v24 = vpack.c.bf16 %v557_v23, %v557_v23 }
 0x3a9   :  { %v1137_v25 = vpop.eup %1136 }
 0x3aa   :  { %v1139_v26 = vpop.eup %1138  ;;  %562 = vst.msk [vmem:[#allocation4 + $0x4] sm:$0xf] %vm560_vm10, %v559_v24  ;;  %v628_v27 = vmul.f32 %v1137_v25, %v1363_v41  ;;  %v1107_v41 = vld [vmem:[#allocation10 + $0x10] sm:$0xff]  }
 0x3ab   :  { %v593_v28 = vmul.f32 %v1139_v26, %v1361_v40  ;;  %v1106_v40 = vld [vmem:[#allocation10 + $0x18] sm:$0xff]  }
 0x3ac   :  { %v630_v29 = vpack.c.bf16 %v628_v27, %v628_v27 }
 0x3ad   :  { %v1141_v30 = vpop.eup %1140  ;;  %v595_v31 = vpack.c.bf16 %v593_v28, %v593_v28 }
 0x3ae   :  { %633 = vst.msk [vmem:[#allocation4] sm:$0xf] %vm632_vm12, %v630_v29  ;;  %v629_v32 = vmul.f32 %v1141_v30, %v1367_v42  ;;  %v1108_v42 = vld [vmem:[#allocation10 + $0x8] sm:$0xff]  }
 0x3af   :  { %598 = vst.msk [vmem:[#allocation4 + $0x4] sm:$0xf] %vm596_vm11, %v595_v31 }
 0x3b0   :  { %v631_v33 = vpack.c.bf16 %v629_v32, %v629_v32 }
 0x3b2   :  { %634 = vst.msk [vmem:[#allocation4 + $0x4] sm:$0xf] %vm632_vm12, %v631_v33 }
 0x3b5   :  { %v635_v35 = vld [vmem:[#allocation4] sm:$0xf] }
 0x3b6   :  { %1015 = vmatmul.mubr.msk.bf16.vlgmr.msra.gmra.mxu0 %vm657_vm13, %v635_v35 }
 0x3b7   :  { %1027 = vmatpush3.bf16.msra.mxu0 %v1102_v34  ;;  %1042 = vmatprep.mubr.msk.bf16.mxu0 %vm1239_vm0, %v1238_v1 }
 0x3b8   :  { %1028 = vmatprep.subr.bf16.mxu0 %v1238_v1 }
 0x3b9   :  { %v636_v37 = vld [vmem:[#allocation4 + $0x4] sm:$0xf] }
 0x3ba   :  { %1023 = vmatmul.mubr.msk.bf16.vlgmr.msra.gmra.mxu1 %vm657_vm13, %v636_v37 }
 0x3bb   :  { %1029 = vmatpush3.bf16.msra.mxu0 %v1103_v36 }
 0x3bc   :  { %1030 = vmatprep.subr.bf16.mxu0 %v1238_v1 }
 0x3bf   :  { %1031 = vmatpush3.bf16.msra.mxu0 %v1104_v38 }
 0x3c0   :  { %1032 = vmatprep.subr.bf16.mxu0 %v1238_v1 }
 0x3c3   :  { %1033 = vmatpush3.bf16.msra.mxu0 %v1105_v39 }
 0x3c4   :  { %1034 = vmatprep.subr.bf16.mxu0 %v1238_v1 }
 0x3c7   :  { %1035 = vmatpush3.bf16.msra.mxu0 %v1106_v40 }
 0x3c8   :  { %1036 = vmatprep.subr.bf16.mxu0 %v1238_v1 }
 0x3cb   :  { %1037 = vmatpush3.bf16.msra.mxu0 %v1107_v41 }
 0x3cc   :  { %1038 = vmatprep.subr.bf16.mxu0 %v1238_v1 }
 0x3cf   :  { %1039 = vmatpush3.bf16.msra.mxu0 %v1108_v42 }
 0x3d0   :  { %1040 = vmatprep.subr.bf16.mxu0 %v1238_v1 }
 0x3d3   :  { %1041 = vmatpush3.bf16.msra.mxu0 %v1109_v43 }
 0x476   :  { %v695_v44 = vpop.f32.mrf.mxu0 }
 0x478   :  { %v1016_v45 = vpop.f32.mrf.mxu0 }
 0x47a   :  { %v698_v46 = vpop.f32.mrf.mxu0  ;;  %v750_v47 = vpop.f32.mrf.mxu1 }
 0x47b   :  { %v756_v48 = vpack.c.bf16 %v750_v47, %v695_v44 }
 0x47c   :  { %v1017_v49 = vpop.f32.mrf.mxu0  ;;  %v1024_v50 = vpop.f32.mrf.mxu1 }
 0x47d   :  { %1043 = vmatmul.mubr.bf16.vlgmr.msra.gmra.mxu0 %v756_v48 }
 0x47e   :  { %v753_v51 = vpop.f32.mrf.mxu1 }
 0x480   :  { %v1025_v52 = vpop.f32.mrf.mxu1 }
 0x53d   :  { %v862_v54 = vpop.f32.mrf.mxu0 }
 0x53e   :  { %v863_v55 = vadd.f32 %v929_v53, %v862_v54 }
 0x53f   :  { %v1044_v56 = vpop.f32.mrf.mxu0 }
 0x540   :  { %869 = vst [vmem:[#allocation11] sm:$0xff] %v863_v55 }
 0x541   :  { %v865_v1 = vpop.f32.mrf.mxu0 }
 0x542   :  { %v866_v57 = vadd.f32 %v929_v53, %v865_v1 }
 0x543   :  { %v1045_v58 = vpop.f32.mrf.mxu0 }
 0x544   :  { %870 = vst [vmem:[#allocation11 + $0x8] sm:$0xff] %v866_v57 }
 0x545   :  { %1213 = shalt.err (!%p1210_p5)
}
 0x546   :  { %882 = dma.vmem_to_hbm [thread:$0]  %s877_s18, 256, %s1413_s5, [#allocation7], %s1232_s28, %s1232_s28, %s1233_s29  }
 0x547   :  { %1226 = dma.done.wait [#allocation7], 256  }
 0x548   :  { %1227 = vsyncadd [#allocation7], 4294967040 }
 0x549   :  { %886 = vsyncpa [#allocation6], 1 }
 0x54a   :  { %887 = vsyncpa [#allocation9], 1 }
 0x54b   :  { %888 = vsyncpa [#allocation7], 1 }

</bundles_post_ra>
